<compile_context>
chip_gen: v5e
topology: v5e:2x2
jax: 0.10.0
libtpu: 0.0.40
codegen_flags: <defaults>
</compile_context>

<pallas_src>
import math
from functools import partial

import numpy as np
import jax
import jax.numpy as jnp
from jax.experimental import pallas as pl
from jax.experimental.pallas import tpu as pltpu

LANE = 128
SUB = 8
_BN_EPS_SCALE = 1.0 / math.sqrt(1.0 + 1e-5)   # BatchNorm1d eval: running_mean=0, running_var=1


def _round_up(v, m):
    return ((v + m - 1) // m) * m


def _pad2(a, r, c):
    return jnp.pad(a, ((0, r - a.shape[0]), (0, c - a.shape[1])))


def _pad1(a, n):
    return jnp.pad(a, (0, n - a.shape[0]))


def _vmem_budget():
    """(per-step tile budget, scoped vmem_limit_bytes), hardware aware.
    v7x: 64 MiB physical -> stay conservative.  v5e/v6e: 128 MiB -> raise the scoped
    limit and let tiles grow (fewer grid steps, longer DMAs)."""
    phys = 64 << 20
    try:
        phys = int(getattr(pltpu.get_tpu_info(), "vmem_capacity_bytes", phys))
    except Exception:
        pass
    if phys <= (64 << 20):
        return 24 << 20, 48 << 20
    return 64 << 20, 100 << 20


def _choose_tiles(n, fin_p, fo_p, budget):
    """Row tile tm and padded node count Np (Np % tm == 0, tm % 8 == 0).
    VMEM accounting covers the double-buffered bf16 A stripe, the resident xs block,
    the bf16 output/gate tiles and the f32 intermediates.  At least two row tiles are
    used so the 'parallel' row axis shards across both v7x TensorCores."""
    np8 = max(SUB, _round_up(n, SUB))
    tm = min(1024, max(SUB, _round_up(-(-np8 // 2), SUB)))   # >= 2 tiles when possible
    while True:
        np_ = _round_up(np8, tm)
        need = (2 * tm * np_ * 2                 # A row stripe (bf16, double-buffered)
                + 2 * np_ * fin_p * 2            # resident xs (counted double-buffered)
                + 2 * tm * LANE * 4              # dinv column (lane padded in VMEM)
                + 2 * fin_p * fo_p * 2           # BN-folded W (bf16)
                + 2 * tm * fo_p * 2              # bf16 output tile
                + 2 * tm * LANE * 2              # bf16 gate slab
                + tm * (2 * fin_p + 2 * fo_p) * 4  # f32 agg / h / out intermediates
                + 4 * fo_p * 4)                  # bias / gate weight
        if need <= budget or tm <= SUB:
            break
        tm = max(SUB, (tm // 2 // SUB) * SUB)
    return tm, _round_up(np8, tm)


# ---------------------------------------------------------------------------
# Pallas kernels
# ---------------------------------------------------------------------------

def _gcn_compute(a_ref, xs_ref, dinv_ref, w_ref, b_ref, tm):
    """agg_i = sum_j A_ij * xs_j + xs_i  (A+I never built; A@X first so the N^2 matmul
    has the smaller F_in inner width), exact f32 d_i^-1/2 row scaling, then the
    BN-folded weight matmul + bias + ReLU."""
    agg = jnp.dot(a_ref[...], xs_ref[...], preferred_element_type=jnp.float32)
    r0 = pl.multiple_of(pl.program_id(0) * tm, SUB)
    agg = agg + xs_ref[pl.ds(r0, tm), :].astype(jnp.float32)   # analytic self-loop term
    h = agg * dinv_ref[...]                                    # (tm,1) broadcast row scale
    out = jnp.dot(h.astype(jnp.bfloat16), w_ref[...],
                  preferred_element_type=jnp.float32) + b_ref[...]
    return jnp.maximum(out, 0.0)                               # BN folded into w/b; ReLU


def _gcn_kernel(a_ref, xs_ref, dinv_ref, w_ref, b_ref, o_ref, *, tm):
    o_ref[...] = _gcn_compute(a_ref, xs_ref, dinv_ref, w_ref, b_ref, tm).astype(o_ref.dtype)


def _gcn_gate_kernel(a_ref, xs_ref, dinv_ref, w_ref, b_ref, p_ref, o_ref, gate_ref, *, tm):
    out = _gcn_compute(a_ref, xs_ref, dinv_ref, w_ref, b_ref, tm)
    o_ref[...] = out.astype(o_ref.dtype)
    s = jnp.sum(out * p_ref[...], axis=-1, keepdims=True)      # VPU/XLU reduction
    gate_ref[...] = jnp.broadcast_to(jnp.tanh(s), gate_ref.shape).astype(gate_ref.dtype)


def gcn_conv_bn_relu(adj_bf16, xs, dinv_col, w_f, b_f, tm, vmem_limit, p_unit=None):
    """Single row-tiled, software-pipelined pass: the N^2 bf16 adjacency is read once."""
    np_, fin_p = xs.shape
    fo_p = w_f.shape[1]
    grid = (np_ // tm,)
    with_gate = p_unit is not None

    in_specs = [
        pl.BlockSpec((tm, np_), lambda i: (i, 0)),       # A row stripe (bf16)
        pl.BlockSpec((np_, fin_p), lambda i: (0, 0)),    # xs = d^-1/2 X, resident
        pl.BlockSpec((tm, 1), lambda i: (i, 0)),         # exact f32 d^-1/2 per row
        pl.BlockSpec((fin_p, fo_p), lambda i: (0, 0)),   # BN-folded W (bf16)
        pl.BlockSpec((1, fo_p), lambda i: (0, 0)),       # BN-folded bias (f32)
    ]
    args = [adj_bf16, xs, dinv_col, w_f, b_f]
    out_specs = [pl.BlockSpec((tm, fo_p), lambda i: (i, 0))]
    out_shape = [jax.ShapeDtypeStruct((np_, fo_p), jnp.bfloat16)]
    if with_gate:
        in_specs.append(pl.BlockSpec((1, fo_p), lambda i: (0, 0)))   # TopK unit weight
        args.append(p_unit)
        out_specs.append(pl.BlockSpec((tm, LANE), lambda i: (i, 0)))  # lane-dense gate
        out_shape.append(jax.ShapeDtypeStruct((np_, LANE), jnp.bfloat16))
        kernel = partial(_gcn_gate_kernel, tm=tm)
    else:
        kernel = partial(_gcn_kernel, tm=tm)

    cost = pl.CostEstimate(
        flops=2 * np_ * np_ * fin_p + 2 * np_ * fin_p * fo_p,
        transcendentals=np_ if with_gate else 0,
        bytes_accessed=(np_ * np_ * 2 + np_ * fin_p * 2 + np_ * 4 + fin_p * fo_p * 2
                        + np_ * fo_p * 2 + (np_ * LANE * 2 if with_gate else 0)))

    outs = pl.pallas_call(
        kernel, grid=grid,
        in_specs=in_specs, out_specs=out_specs, out_shape=out_shape,
        compiler_params=pltpu.CompilerParams(
            dimension_semantics=("parallel",), vmem_limit_bytes=vmem_limit),
        cost_estimate=cost,
    )(*args)
    if with_gate:
        return outs[0], outs[1]
    return outs[0], None


def _linear_kernel(x_ref, w_ref, b_ref, o_ref, *, relu):
    h = jnp.dot(x_ref[...].astype(jnp.bfloat16), w_ref[...].astype(jnp.bfloat16),
                preferred_element_type=jnp.float32) + b_ref[...].astype(jnp.float32)
    if relu:
        h = jnp.maximum(h, 0.0)
    o_ref[...] = h


def linear(x, w, b, relu=True):
    vmem = pl.BlockSpec(memory_space=pltpu.MemorySpace.VMEM)
    return pl.pallas_call(
        partial(_linear_kernel, relu=relu),
        out_shape=jax.ShapeDtypeStruct((x.shape[0], w.shape[1]), jnp.float32),
        in_specs=[vmem, vmem, vmem],
        out_specs=vmem,
    )(x, w, b.reshape(1, -1))


# ---------------------------------------------------------------------------
# Model glue (params, dense adjacency, device-side TopK pooling, forward)
# ---------------------------------------------------------------------------

def init_params(key, input_dim, output_dim, npool, mult_feat_per_conv=2, pool_ratio=0.8):
    state = {"key": key}

    def split():
        state["key"], sub = jax.random.split(state["key"])
        return sub

    def conv(fin, fout):
        return {"w": 0.2 * jax.random.normal(split(), (fin, fout), jnp.float32),
                "b": 0.05 * jax.random.normal(split(), (fout,), jnp.float32),
                "gamma": jnp.ones((fout,), jnp.float32),
                "beta": jnp.zeros((fout,), jnp.float32)}

    def lin(fin, fout):
        return {"w": 0.2 * jax.random.normal(split(), (fin, fout), jnp.float32),
                "b": 0.05 * jax.random.normal(split(), (fout,), jnp.float32)}

    def pool(f):
        return {"w": jax.random.normal(split(), (f,), jnp.float32)}

    params = {"convs": [], "pools": [], "linears": [], "pool_ratio": pool_ratio}
    d = input_dim
    params["convs"].append(conv(d, mult_feat_per_conv * d))
    d = mult_feat_per_conv * d
    params["linears"].append(lin(d, output_dim))
    for _ in range(npool):
        params["pools"].append(pool(d))
        params["convs"].append(conv(d, mult_feat_per_conv * d))
        params["linears"].append(lin(mult_feat_per_conv * d, d))
        d = mult_feat_per_conv * d
    return params


def dense_adjacency(edge_index, edge_weight, num_nodes):
    a = np.zeros((num_nodes, num_nodes), np.float32)
    src, dst = np.asarray(edge_index)
    a[dst, src] = np.asarray(edge_weight)      # message j -> i aggregated on row i
    return a


def topk_pool_device(x_out, gate, adj_p, src, dst, w_e, batch_np, ratio, num_graphs):
    """torch_geometric TopKPooling with the gate already fused into the conv kernel.
    Per-graph top-k runs on device (lax.top_k, static k = ceil(ratio*n_g), batch vector
    host-known -> no device->host sync).  The pooled adjacency is ONE fused gather and
    the edge list is remapped on device for the next layer's exact f32 degree."""
    np_pad = x_out.shape[0]
    n_valid = batch_np.shape[0]
    g0 = gate[:, 0].astype(jnp.float32)
    batch_pad = np.full((np_pad,), -1, np.int64)
    batch_pad[:n_valid] = batch_np

    perms, counts = [], []
    for g in range(num_graphs):
        n_g = int((batch_np == g).sum())
        k_g = int(math.ceil(ratio * n_g))
        masked = jnp.where(jnp.asarray(batch_pad == g), g0, -jnp.inf)
        _, idx = jax.lax.top_k(masked, k_g)
        perms.append(idx)
        counts.append(k_g)
    perm = jnp.concatenate(perms)
    n_new = int(sum(counts))

    gate_sel = jnp.take(g0, perm, axis=0)[:, None]
    x_new = (jnp.take(x_out, perm, axis=0).astype(jnp.float32) * gate_sel).astype(jnp.bfloat16)
    adj_new = adj_p[perm[:, None], perm[None, :]]     # single fused induced-subgraph gather

    inv = jnp.full((n_valid,), -1, jnp.int32).at[perm].set(jnp.arange(n_new, dtype=jnp.int32))
    ns, nd = inv[src], inv[dst]
    keep = (ns >= 0) & (nd >= 0)
    src_new = jnp.where(keep, ns, 0)
    dst_new = jnp.where(keep, nd, 0)
    w_new = jnp.where(keep, w_e, 0.0)                 # dropped edges contribute 0 to deg

    batch_new = np.repeat(np.arange(num_graphs), counts)
    return x_new, adj_new, src_new, dst_new, w_new, batch_new


def pool_gcn_forward(x, edge_index, edge_weight, batch_np, params, npool, output_dim):
    num_graphs = int(batch_np.max()) + 1
    n_valid, f_in = x.shape
    budget, vmem_limit = _vmem_budget()
    ratio = params["pool_ratio"]

    src = jnp.asarray(edge_index[0], jnp.int32)
    dst = jnp.asarray(edge_index[1], jnp.int32)
    w_e = jnp.asarray(edge_weight, jnp.float32)

    x_cur = jnp.asarray(x, jnp.float32)
    adj_cur = jnp.asarray(dense_adjacency(edge_index, edge_weight, n_valid), jnp.bfloat16)
    fin_p = _round_up(f_in, LANE)

    x_final, np_final = None, None
    for i in range(npool + 1):
        c = params["convs"][i]
        fo_p = _round_up(c["w"].shape[1], LANE)
        tm, np_ = _choose_tiles(n_valid, fin_p, fo_p, budget)

        # exact f32 GCN degree from the O(E) edge list (+1 analytic self loop);
        # A is only ever read once, inside the propagation kernel.
        deg = jax.ops.segment_sum(w_e, dst, num_segments=n_valid) + 1.0
        dinv = jax.lax.rsqrt(deg)

        xs = _pad2(x_cur.astype(jnp.float32) * dinv[:, None], np_, fin_p).astype(jnp.bfloat16)
        dinv_col = _pad1(dinv, np_).reshape(-1, 1)          # zero rows for padding
        adj_p = _pad2(adj_cur, np_, np_)

        # Fold BatchNorm1d into the conv weights/bias.
        # TODO(synk): eval stats (mean=0, var=1) assumed; trained running stats change the fold.
        scale = c["gamma"] * _BN_EPS_SCALE
        w_f = _pad2(c["w"] * scale[None, :], fin_p, fo_p).astype(jnp.bfloat16)
        b_f = _pad1(c["b"] * scale + c["beta"], fo_p).reshape(1, -1)

        if i < npool:
            pw = params["pools"][i]["w"]
            p_unit = _pad1(pw * jax.lax.rsqrt(jnp.sum(pw * pw)), fo_p).reshape(1, -1)
        else:
            p_unit = None                                   # last layer: gate-free kernel

        x_out, gate = gcn_conv_bn_relu(adj_p, xs, dinv_col, w_f, b_f, tm, vmem_limit, p_unit)
        # TODO(synk): F.dropout after each conv block is stochastic (training-mode in the
        # reference forward); applied as identity here.

        if i < npool:
            x_cur, adj_cur, src, dst, w_e, batch_np = topk_pool_device(
                x_out, gate, adj_p, src, dst, w_e, batch_np, ratio, num_graphs)
            n_valid = x_cur.shape[0]
        else:
            x_final, np_final = x_out, np_
        fin_p = fo_p

    # global_mean_pool as (G_pad, Np) @ (Np, F_pad) bf16 Pallas matmul (pool matrix is
    # static: the surviving batch vector is host-known, padded rows/graphs are zero).
    g_pad = _round_up(num_graphs, SUB)
    pool_mat = np.zeros((g_pad, np_final), np.float32)
    for g in range(num_graphs):
        idx = np.nonzero(batch_np == g)[0]
        pool_mat[g, idx] = 1.0 / idx.size
    h = linear(jnp.asarray(pool_mat, jnp.bfloat16), x_final,
               jnp.zeros((x_final.shape[1],), jnp.float32), relu=False)

    # FullyConnectedLinearBlock chain, applied reversed as in the reference forward.
    # TODO(synk): block internals assumed Linear -> ReLU -> Dropout (dropout identity),
    # so ReLU is applied on every block including the last.
    for lin_p in params["linears"][::-1]:
        w_p = _pad2(lin_p["w"], _round_up(lin_p["w"].shape[0], LANE),
                    _round_up(lin_p["w"].shape[1], LANE))
        b_p = _pad1(lin_p["b"], _round_up(lin_p["b"].shape[0], LANE))
        h = linear(h, w_p, b_p, relu=True)
    return h[:num_graphs, :output_dim]


# ---------------------------------------------------------------------------
# Example
# ---------------------------------------------------------------------------

if __name__ == "__main__":
    INPUT_DIM, OUTPUT_DIM, NPOOL = 4, 3, 2
    NODES_PER_GRAPH, NUM_GRAPHS = 8, 2
    N = NODES_PER_GRAPH * NUM_GRAPHS

    key = jax.random.PRNGKey(0)
    k_x, k_w, k_params = jax.random.split(key, 3)

    # node features
    x = jax.random.normal(k_x, (N, INPUT_DIM), jnp.float32)

    # deterministic graph: per-graph ring + 2 chords, symmetric weighted edges
    # TODO(synk): edge_attr from the reference `edge_tensor` packing is ignored
    # (GCNConv consumes edge_weight only).
    pairs = []
    for g in range(NUM_GRAPHS):
        off = g * NODES_PER_GRAPH
        for i in range(NODES_PER_GRAPH):
            pairs.append((off + i, off + (i + 1) % NODES_PER_GRAPH))
        pairs.append((off + 0, off + 4))
        pairs.append((off + 2, off + 6))
    und_w = np.asarray(jax.random.uniform(k_w, (len(pairs),), jnp.float32,
                                          minval=0.5, maxval=1.5))
    srcs, dsts, wts = [], [], []
    for (s, d), w in zip(pairs, und_w):
        srcs += [s, d]; dsts += [d, s]; wts += [float(w), float(w)]
    edge_index = np.stack([np.asarray(srcs, np.int32), np.asarray(dsts, np.int32)])  # (2, 40)
    edge_weight = np.asarray(wts, np.float32)                                         # (40,)
    batch_np = np.repeat(np.arange(NUM_GRAPHS), NODES_PER_GRAPH)                      # (16,)

    params = init_params(k_params, INPUT_DIM, OUTPUT_DIM, NPOOL,
                         mult_feat_per_conv=2, pool_ratio=0.8)

    out = pool_gcn_forward(x, edge_index, edge_weight, batch_np, params, NPOOL, OUTPUT_DIM)
    out = jax.block_until_ready(out)
    assert out.shape == (NUM_GRAPHS, OUTPUT_DIM), out.shape
    assert bool(jnp.all(jnp.isfinite(out)))
    print("KERNEL_OK")
</pallas_src>

<mosaic_0001>
module attributes {stable_mosaic.version = 11 : i64} {
  func.func @_gcn_gate_kernel(%arg0: i32, %arg1: memref<8x16xbf16, #tpu.memory_space<vmem>>, %arg2: memref<16x128xbf16, #tpu.memory_space<vmem>>, %arg3: memref<8x1xf32, #tpu.memory_space<vmem>>, %arg4: memref<128x128xbf16, #tpu.memory_space<vmem>>, %arg5: memref<1x128xf32, #tpu.memory_space<vmem>>, %arg6: memref<1x128xf32, #tpu.memory_space<vmem>>, %arg7: memref<8x128xbf16, #tpu.memory_space<vmem>>, %arg8: memref<8x128xbf16, #tpu.memory_space<vmem>>) attributes {dimension_semantics = [#tpu.dimension_semantics<parallel>], iteration_bounds = array<i64: 2>, scalar_prefetch = 0 : i64, scratch_operands = 0 : i64, tpu.core_type = #tpu.core_type<tc>, window_params = [{transform_indices = @transform_0, window_bounds = array<i64: 8, 16>}, {pipeline_mode = #tpu.pipeline_mode<synchronous>, transform_indices = @transform_1, window_bounds = array<i64: 16, 128>}, {transform_indices = @transform_2, window_bounds = array<i64: 8, 1>}, {pipeline_mode = #tpu.pipeline_mode<synchronous>, transform_indices = @transform_3, window_bounds = array<i64: 128, 128>}, {pipeline_mode = #tpu.pipeline_mode<synchronous>, transform_indices = @transform_4, window_bounds = array<i64: 1, 128>}, {pipeline_mode = #tpu.pipeline_mode<synchronous>, transform_indices = @transform_5, window_bounds = array<i64: 1, 128>}, {transform_indices = @transform_6, window_bounds = array<i64: 8, 128>}, {transform_indices = @transform_7, window_bounds = array<i64: 8, 128>}]} {
    %c0 = arith.constant 0 : index
    %c0_0 = arith.constant 0 : index
    %0 = vector.load %arg1[%c0, %c0_0] : memref<8x16xbf16, #tpu.memory_space<vmem>>, vector<8x16xbf16>
    %c0_1 = arith.constant 0 : index
    %c0_2 = arith.constant 0 : index
    %1 = vector.load %arg2[%c0_1, %c0_2] : memref<16x128xbf16, #tpu.memory_space<vmem>>, vector<16x128xbf16>
    %cst = arith.constant dense<0.000000e+00> : vector<8x128xf32>
    %2 = tpu.matmul %0, %1, %cst {dimension_numbers = #tpu.dot_dimension_numbers<[1], [0], [0], [1], [0, 0, 1, 1], [], []>} : vector<8x16xbf16>, vector<16x128xbf16>, vector<8x128xf32> -> vector<8x128xf32>
    %c8_i32 = arith.constant 8 : i32
    %3 = arith.muli %arg0, %c8_i32 : i32
    %4 = tpu.assume_multiple %3, 8 : i32
    %5 = arith.index_cast %4 : i32 to index
    %c0_3 = arith.constant 0 : index
    %6 = vector.load %arg2[%5, %c0_3] : memref<16x128xbf16, #tpu.memory_space<vmem>>, vector<8x128xbf16>
    %7 = arith.extf %6 : vector<8x128xbf16> to vector<8x128xf32>
    %8 = arith.addf %2, %7 : vector<8x128xf32>
    %c0_4 = arith.constant 0 : index
    %c0_5 = arith.constant 0 : index
    %9 = vector.load %arg3[%c0_4, %c0_5] : memref<8x1xf32, #tpu.memory_space<vmem>>, vector<8x1xf32>
    %10 = vector.broadcast %9 : vector<8x1xf32> to vector<8x128xf32>
    %11 = arith.mulf %8, %10 : vector<8x128xf32>
    %12 = arith.truncf %11 : vector<8x128xf32> to vector<8x128xbf16>
    %c0_6 = arith.constant 0 : index
    %c0_7 = arith.constant 0 : index
    %13 = vector.load %arg4[%c0_6, %c0_7] : memref<128x128xbf16, #tpu.memory_space<vmem>>, vector<128x128xbf16>
    %cst_8 = arith.constant dense<0.000000e+00> : vector<8x128xf32>
    %14 = tpu.matmul %12, %13, %cst_8 {dimension_numbers = #tpu.dot_dimension_numbers<[1], [0], [0], [1], [0, 0, 1, 1], [], []>} : vector<8x128xbf16>, vector<128x128xbf16>, vector<8x128xf32> -> vector<8x128xf32>
    %c0_9 = arith.constant 0 : index
    %c0_10 = arith.constant 0 : index
    %15 = vector.load %arg5[%c0_9, %c0_10] : memref<1x128xf32, #tpu.memory_space<vmem>>, vector<1x128xf32>
    %16 = vector.broadcast %15 : vector<1x128xf32> to vector<8x128xf32>
    %17 = arith.addf %14, %16 : vector<8x128xf32>
    %cst_11 = arith.constant 0.000000e+00 : f32
    %18 = vector.broadcast %cst_11 : f32 to vector<8x128xf32>
    %19 = arith.maximumf %17, %18 : vector<8x128xf32>
    %20 = arith.truncf %19 : vector<8x128xf32> to vector<8x128xbf16>
    %c0_12 = arith.constant 0 : index
    %c0_13 = arith.constant 0 : index
    %21 = vector.load %arg7[%c0_12, %c0_13] : memref<8x128xbf16, #tpu.memory_space<vmem>>, vector<8x128xbf16>
    tpu.vector_store %arg7[%c0_12, %c0_13], %20 {strides = array<i32>} : memref<8x128xbf16, #tpu.memory_space<vmem>>, vector<8x128xbf16>,
    %c0_14 = arith.constant 0 : index
    %c0_15 = arith.constant 0 : index
    %22 = vector.load %arg6[%c0_14, %c0_15] : memref<1x128xf32, #tpu.memory_space<vmem>>, vector<1x128xf32>
    %23 = vector.broadcast %22 : vector<1x128xf32> to vector<8x128xf32>
    %24 = arith.mulf %19, %23 : vector<8x128xf32>
    %cst_16 = arith.constant dense<0.000000e+00> : vector<8xf32>
    %25 = vector.multi_reduction <add>, %24, %cst_16 [1] : vector<8x128xf32> to vector<8xf32>
    %26 = vector.shape_cast %25 : vector<8xf32> to vector<8x1xf32>
    %27 = math.tanh %26 : vector<8x1xf32>
    %28 = vector.shape_cast %27 : vector<8x1xf32> to vector<8x1xf32>
    %29 = vector.broadcast %28 : vector<8x1xf32> to vector<8x128xf32>
    %30 = arith.truncf %29 : vector<8x128xf32> to vector<8x128xbf16>
    %c0_17 = arith.constant 0 : index
    %c0_18 = arith.constant 0 : index
    %31 = vector.load %arg8[%c0_17, %c0_18] : memref<8x128xbf16, #tpu.memory_space<vmem>>, vector<8x128xbf16>
    tpu.vector_store %arg8[%c0_17, %c0_18], %30 {strides = array<i32>} : memref<8x128xbf16, #tpu.memory_space<vmem>>, vector<8x128xbf16>,
    return
  }
  func.func @transform_0(%arg0: i32) -> (i32, i32) {
    %c0_i32 = arith.constant 0 : i32
    %c0_i32_0 = arith.constant 0 : i32
    return %arg0, %c0_i32 : i32, i32
  }
  func.func @transform_1(%arg0: i32) -> (i32, i32) {
    %c0_i32 = arith.constant 0 : i32
    %c0_i32_0 = arith.constant 0 : i32
    %c0_i32_1 = arith.constant 0 : i32
    return %c0_i32, %c0_i32_0 : i32, i32
  }
  func.func @transform_2(%arg0: i32) -> (i32, i32) {
    %c0_i32 = arith.constant 0 : i32
    %c0_i32_0 = arith.constant 0 : i32
    return %arg0, %c0_i32 : i32, i32
  }
  func.func @transform_3(%arg0: i32) -> (i32, i32) {
    %c0_i32 = arith.constant 0 : i32
    %c0_i32_0 = arith.constant 0 : i32
    %c0_i32_1 = arith.constant 0 : i32
    return %c0_i32, %c0_i32_0 : i32, i32
  }
  func.func @transform_4(%arg0: i32) -> (i32, i32) {
    %c0_i32 = arith.constant 0 : i32
    %c0_i32_0 = arith.constant 0 : i32
    %c0_i32_1 = arith.constant 0 : i32
    return %c0_i32, %c0_i32_0 : i32, i32
  }
  func.func @transform_5(%arg0: i32) -> (i32, i32) {
    %c0_i32 = arith.constant 0 : i32
    %c0_i32_0 = arith.constant 0 : i32
    %c0_i32_1 = arith.constant 0 : i32
    return %c0_i32, %c0_i32_0 : i32, i32
  }
  func.func @transform_6(%arg0: i32) -> (i32, i32) {
    %c0_i32 = arith.constant 0 : i32
    %c0_i32_0 = arith.constant 0 : i32
    return %arg0, %c0_i32 : i32, i32
  }
  func.func @transform_7(%arg0: i32) -> (i32, i32) {
    %c0_i32 = arith.constant 0 : i32
    %c0_i32_0 = arith.constant 0 : i32
    return %arg0, %c0_i32 : i32, i32
  }
}

</mosaic_0001>

<bundles_post_ra>
// kernel: tpu_custom_call.1
= control target key start
LH: loop header
LB: loop body
LE: loop exit
PB: predicated region body
PF: predicated region fallthrough
CT: control target
= control target key end

     0   :  { %13 = vsyncpa [#allocation3], 0  ;;  %s1046_s0 = inlined_call_operand.vmem [shape: bf16[16,16], index: 0, kind: input, shape index: {}]   ;;  %s1047_s1 = inlined_call_operand.vmem [shape: bf16[16,128], index: 1, kind: input, shape index: {}]   ;;  %s1048_s2 = inlined_call_operand.vmem [shape: f32[16,1], index: 2, kind: input, shape index: {}]   ;;  %s1049_s3 = inlined_call_operand.hbm [shape: bf16[128,128], index: 3, kind: input, shape index: {}]   ;;  %s1050_s4 = inlined_call_operand.vmem [shape: f32[1,128], index: 4, kind: input, shape index: {}]   ;;  %s1051_s5 = inlined_call_operand.vmem [shape: f32[1,128], index: 5, kind: input, shape index: {}]   ;;  %s1052_s6 = inlined_call_operand.hbm [shape: bf16[16,128], index: 6, kind: output, shape index: {0}]   ;;  %s1053_s7 = inlined_call_operand.hbm [shape: bf16[16,128], index: 7, kind: output, shape index: {1}]  }
   0x1   :  { %14 = vsyncpa [#allocation4], 0 }
   0x2   :  { %16 = vsyncpa [#allocation4 + $0x1], 0 }
   0x3   :  { %17 = vsyncpa [#allocation7], 0 }
   0x4   :  { %19 = vsyncpa [#allocation7 + $0x1], 0  ;;  %s909_s24 = smov 0   ;;  %s911_s25 = smov 0  }
   0x5   :  { %s913_s26 = smov 0   ;;  %s915_s27 = smov 0  }
   0x6 LB: > { %s930_s28 = sadd.s32 4294967295, %s863_s27   ;;  %s608_s29 = sadd.s32 4294967294, %s863_s27   ;;  %s863_s27 = sphi %s915_s27, %s1059_s27   ;;  %s859_s26 = sphi %s913_s26, %s1058_s26   ;;  %s855_s25 = sphi %s911_s25, %s1057_s25   ;;  %s851_s24 = sphi %s909_s24, %s1056_s24  }
   0x7   : > { %s934_s30 = sadd.s32 1, %s863_s27   ;;  %s168_s8 = sadd.s32 1, %s859_s26 }
   0x8   : > { %s165_s9 = ssub.s32 %s863_s27, %s934_s30  ;;  %p178_p0 = scmp.ne.s32.totalorder %s859_s26, %s855_s25 }
   0x9   : > { %p166_p1 = scmp.eq.s32.totalorder %s165_s9, 0  ;;  %p179_p2 = scmp.eq.s32.totalorder %s930_s28, 1 }
   0xa   : > { %p184_p3 = scmp.ne.s32.totalorder %s855_s25, %s851_s24  ;;  %p185_p4 = scmp.eq.s32.totalorder %s608_s29, 1 }
   0xb   : > { %s945_s10 = scalar_select %p166_p1, %s859_s26, %s168_s8  }
   0xc   : > { %p947_p5 = por %p179_p2, %p178_p0  ;;  %p951_p6 = por %p185_p4, %p184_p3 }
   0xd   : > { %p609_p7 = scmp.ge.s32.totalorder %s863_s27, 1  ;;  %p218_p8 = scmp.lt.s32.totalorder %s863_s27, 3 }
   0xe   : > { %p691_p9 = scmp.eq.s32.totalorder %s930_s28, 0  ;;  %s232_s15 = sshll.u32 %s1049_s3, 4  ;;  %s233_s15 = int_to_ptr.hbm [resolvable:$true] %s232_s15 }
   0xf   : > { %p219_p10 = pnand %p609_p7, %p218_p8  ;;  %s865_s16 = smov [#allocation2]  }
  0x10   : > { %s234_s17 = sshll.u32 %s865_s16, 4  ;;  %s866_s18 = smov 64   ;;  %s235_s17 = int_to_ptr.vmem [resolvable:$true] %s234_s17 }
  0x11   : > { %p680_p11 = pneg %p219_p10  ;;  %s867_s19 = smov 4  }
  0x12   : > { %270 = sbr.rel (%p219_p10) target bundleno = 424 (0x1a8), region = 44 }
  0x13   : > { %p681_p12 = pnand %p691_p9, %p680_p11 }
  0x15   : > { %683 = dma.hbm_to_vmem [thread:$0]  (!%p681_p12), %s233_s15, 1024, %s235_s17, [#allocation3], %s866_s18, %s866_s18, %s867_s19  }
  0x17   : > { %838 = dma.done.wait (%p691_p9), [#allocation3], 1024  }
  0x18   : > { %840 = vsyncadd (%p691_p9), [#allocation3], 4294966272  ;;  %p311_p13 = scmp.lt.s32.totalorder %s930_s28, 1  ;;  %v868_v0 = vmov 0   ;;  %v663_v1 = vld [vmem:[%s1047_s1] sm:$0xff]  ;;  %v671_v3 = vld [vmem:[#allocation2 + $0x38] sm:$0xff] }
  0x19   : > { %730 = vset.pattern.permute.xlu0 %v868_v0  ;;  %347 = vmatpush.bf16.msra.mxu0 %v663_v1  ;;  %vm336_vm0 = vcmask 130048   ;;  %v670_v5 = vld [vmem:[#allocation2 + $0x30] sm:$0xff]  ;;  %v669_v6 = vld [vmem:[#allocation2 + $0x28] sm:$0xff]  ;;  %v668_v7 = vld [vmem:[#allocation2 + $0x20] sm:$0xff]  ;;  %s618_s17 = sshll.u32 %s930_s28, 3  ;;  %s983_s23 = sand.u32 1, %s855_s25  }
  0x1a   : > { %s312_s20 = scalar_select %p311_p13, %s930_s28, 1  ;;  %429 = vmatpush.bf16.msra.mxu1 %v671_v3  ;;  %v667_v8 = vld [vmem:[#allocation2 + $0x18] sm:$0xff]  ;;  %v666_v9 = vld [vmem:[#allocation2 + $0x10] sm:$0xff]  ;;  %v665_v10 = vld [vmem:[#allocation2 + $0x8] sm:$0xff] }
  0x1b   : > { %v664_v11 = vld [vmem:[#allocation2] sm:$0xff]  ;;  %s324_s18 = sshra.s32 %s618_s17, 3  ;;  %s614_s9 = sshll.u32 %s983_s23, 2 }
  0x1c   : > { %s616_s21 = sshll.u32 %s312_s20, 2  ;;  %s617_s22 = sshll.u32 %s312_s20, 3  ;;  %v731_v20 = vld [vmem:[%s1050_s4] ss:$0 sm:$0xff] }
  0x1d   : > { %s318_s8 = scalar_lea.vmem %s1048_s2, %s617_s22  ;;  %s314_s14 = scalar_lea.vmem %s1046_s0, %s616_s21  ;;  %v732_v23 = vld [vmem:[%s1051_s5] ss:$0 sm:$0xff] }
  0x1e   : > { %v353_v2 = vld [vmem:[%s318_s8] sm:$0xff]  ;;  %430 = vmatpush.bf16.msra.mxu1 %v670_v5  ;;  %s619_s19 = sshll.u32 %s324_s18, 2  ;;  %s659_s15 = sshll.u32 %s930_s28, 2 }
  0x1f   : > { %356 = vperm.xlu0 %730, %v353_v2   ;;  %v320_v4 = vld [vmem:[%s314_s14] sm:$0xf]  ;;  %s327_s22 = scalar_lea.vmem %s1047_s1, %s619_s19  ;;  %s471_s18 = scalar_lea.hbm %s1052_s6, %s659_s15 }
  0x20   : > { %624 = vmatmul.msk.bf16.vlgmr.msra.gmra.mxu0 %vm336_vm0, %v320_v4  ;;  %v328_v12 = vld [vmem:[%s327_s22] sm:$0xf]  ;;  %s303_s19 = scalar_lea.vmem [#allocation5], %s614_s9  ;;  %s475_s21 = sshll.u32 %s471_s18, 4  ;;  %s476_s21 = int_to_ptr.hbm [resolvable:$true] %s475_s21 }
  0x21   : > { %v329_v13 = vunpack.c.l.bf16 %v328_v12  ;;  %s473_s20 = sshll.u32 %s303_s19, 4  ;;  %s456_s22 = scalar_lea.sflag [#allocation4], %s983_s23  ;;  %s474_s20 = int_to_ptr.vmem [resolvable:$true] %s473_s20 }
  0x22   : > { %431 = vmatpush.bf16.msra.mxu1 %v669_v6  ;;  %s779_s29 = sshra.s32 %s476_s21, 4  ;;  %s785_s16 = scalar_lea.hbm %s1052_s6, 8  ;;  %s780_s29 = int_to_ptr.hbm [resolvable:$true] %s779_s29 }
  0x23   : > { %s781_s8 = scalar_lea.hbm %s780_s29, 4  ;;  %p786_p3 = scmp.lt.s32.totalorder %s780_s29, %s1052_s6 }
  0x24   : > { %p782_p0 = scmp.ne.s32.totalorder %s780_s29, %s781_s8  ;;  %p787_p4 = scmp.lt.s32.totalorder %s785_s16, %s781_s8 }
  0x26   : > { %432 = vmatpush.bf16.msra.mxu1 %v668_v7  ;;  %p783_p1 = pnand %p782_p0, %p947_p5  ;;  %p788_p7 = por %p787_p4, %p786_p3 }
  0x28   : > { %p784_p2 = pneg %p783_p1 }
  0x2a   : > { %433 = vmatpush.bf16.msra.mxu1 %v667_v8  ;;  %p789_p8 = pnand %p788_p7, %p784_p2 }
  0x2e   : > { %434 = vmatpush.bf16.msra.mxu1 %v666_v9 }
  0x32   : > { %435 = vmatpush.bf16.msra.mxu1 %v665_v10 }
  0x36   : > { %436 = vmatpush.bf16.msra.mxu1 %v664_v11 }
  0x91   : > { %v357_v15 = vpop.permute.xlu0 %356 }
  0x9d   : > { %v349_v14 = vpop.f32.mrf.mxu0 }
  0x9e   : > { %v350_v16 = vadd.f32 %v349_v14, %v329_v13 }
  0xa0   : > { %v359_v17 = vmul.f32 %v357_v15, %v350_v16 }
  0xa2   : > { %v360_v18 = vpack.c.bf16 %v359_v17, %v359_v17 }
  0xa4   : > { %437 = vmatmul.bf16.vlgmr.msra.gmra.mxu1 %v360_v18 }
  0xa5   : > { %v351_v19 = vpop.f32.mrf.mxu0 }
 0x121   : > { %v438_v21 = vpop.f32.mrf.mxu1 }
 0x122   : > { %v439_v22 = vadd.f32 %v731_v20, %v438_v21 }
 0x124   : > { %v442_v24 = vmax.f32 %v439_v22, 0.0 }
 0x126   : > { %v443_v25 = vpack.c.bf16 %v442_v24, %v442_v24  ;;  %v449_v26 = vmul.f32 %v732_v23, %v442_v24 }
 0x128   : > { %450 = vadd.xlane.f32.xlu0 %v449_v26  ;;  %444 = vst [vmem:[%s303_s19] sm:$0xf] %v443_v25 }
 0x129   : > { %v440_v27 = vpop.f32.mrf.mxu1 }
 0x12a   : > { %792 = shalt.err (!%p789_p8)
}
 0x12b   : > { %676 = dma.vmem_to_hbm [thread:$0]  (%p947_p5), %s474_s20, 64, %s476_s21, %s456_s22  }
 0x12c   : > { %s485_s14 = scalar_lea.hbm %s1053_s7, %s659_s15  ;;  %s310_s29 = scalar_lea.vmem [#allocation6], %s614_s9 }
 0x12d   : > { %s487_s8 = sshll.u32 %s310_s29, 4  ;;  %s489_s16 = sshll.u32 %s485_s14, 4  ;;  %s488_s8 = int_to_ptr.vmem [resolvable:$true] %s487_s8  ;;  %s490_s16 = int_to_ptr.hbm [resolvable:$true] %s489_s16 }
 0x12e   : > { %s461_s17 = scalar_lea.sflag [#allocation7], %s983_s23  ;;  %s807_s18 = sshra.s32 %s490_s16, 4  ;;  %s808_s18 = int_to_ptr.hbm [resolvable:$true] %s807_s18 }
 0x12f   : > { %s809_s20 = scalar_lea.hbm %s808_s18, 4  ;;  %s813_s15 = scalar_lea.hbm %s1053_s7, 8 }
 0x130   : > { %p810_p9 = scmp.ne.s32.totalorder %s808_s18, %s809_s20  ;;  %p814_p12 = scmp.lt.s32.totalorder %s808_s18, %s1053_s7 }
 0x131   : > { %p815_p13 = scmp.lt.s32.totalorder %s813_s15, %s809_s20 }
 0x132   : > { %p811_p10 = pnand %p810_p9, %p947_p5 }
 0x133   : > { %p816_p0 = por %p815_p13, %p814_p12 }
 0x134   : > { %p812_p11 = pneg %p811_p10 }
 0x136   : > { %p817_p1 = pnand %p816_p0, %p812_p11 }
 0x19b   : > { %v451_v28 = vpop.xlane.xlu0 %450 }
 0x19c   : > { %733 = vtanh.f32 %v451_v28 }
 0x1a2   : > { %v734_v29 = vpop.eup %733 }
 0x1a3   : > { %v453_v30 = vpack.c.bf16 %v734_v29, %v734_v29 }
 0x1a5   : > { %454 = vst [vmem:[%s310_s29] sm:$0xf] %v453_v30 }
 0x1a6   : > { %820 = shalt.err (!%p817_p1)
}
 0x1a7   : > { %677 = dma.vmem_to_hbm [thread:$0]  (%p947_p5), %s488_s8, 64, %s490_s16, %s461_s17  }
 0x1a8 PF: > { %p693_p2 = scmp.ge.s32.totalorder %s863_s27, 2  ;;  %s501_s23 = sand.u32 1, %s851_s24  }
 0x1a9   : > { %s502_s19 = scalar_lea.sflag [#allocation4], %s501_s23 }
 0x1aa   : > { %p685_p3 = pnand %p693_p2, %p951_p6 }
 0x1ac   : > { %p686_p4 = pneg %p685_p3 }
 0x1ae   : > { %842 = dma.done.wait (%p686_p4), %s502_s19, 64  }
 0x1af   : > { %844 = vsyncadd (%p686_p4), %s502_s19, 4294967232  ;;  %s512_s13 = scalar_lea.sflag [#allocation7], %s501_s23 }
 0x1b0   : > { %846 = dma.done.wait (%p686_p4), %s512_s13, 64  }
 0x1b1   : > { %848 = vsyncadd (%p686_p4), %s512_s13, 4294967232  ;;  %p22_p5 = scmp.ge.s32.totalorder %s934_s30, 4   ;;  %s1056_s24 = smov %s855_s25 }
 0x1b2   : > { %s1057_s25 = smov %s859_s26  ;;  %s1058_s26 = smov %s945_s10 }
 0x1b3   : > { %s1059_s27 = smov %s934_s30  ;;  %24 = sbr.rel (!%p22_p5) target bundleno = 6 (0x6), region = 105 }
 0x1b8   :  { %518 = vsyncpa [#allocation3], 1 }
 0x1b9   :  { %520 = vsyncpa [#allocation3 + $0x1], 1 }
 0x1ba   :  { %521 = vsyncpa [#allocation4], 1 }
 0x1bb   :  { %523 = vsyncpa [#allocation4 + $0x1], 1 }
 0x1bc   :  { %524 = vsyncpa [#allocation7], 1 }
 0x1bd   :  { %526 = vsyncpa [#allocation7 + $0x1], 1 }

</bundles_post_ra>
